<compile_context>
chip_gen: v5e
topology: v5e:2x2
jax: 0.10.0
libtpu: 0.0.40
codegen_flags: <defaults>
</compile_context>

<pallas_src>
import functools
import numpy as np
import jax
import jax.numpy as jnp
from jax import lax
from jax.experimental import pallas as pl
from jax.experimental.pallas import tpu as pltpu

_NEG_INF = -1000000000.0


def _vmem_limit_bytes():
    cap = 128 * 1024 * 1024
    try:
        info = pltpu.get_tpu_info()
        cap = int(getattr(info, "vmem_capacity_bytes", cap))
    except Exception:
        pass
    # v5e/v6e (128 MiB physical) -> 96 MiB scoped; v7x (64 MiB) -> 48 MiB.
    return int(min(100 * 1024 * 1024, (cap * 3) // 4))


VMEM_LIMIT = _vmem_limit_bytes()


def _compiler_params():
    return pltpu.CompilerParams(dimension_semantics=("parallel",),
                                vmem_limit_bytes=VMEM_LIMIT)


def _round_up(x, m):
    return ((x + m - 1) // m) * m


def _tile_and_pad(M, pref=512, base=16):
    """Pick a row tile (multiple of `base`) and a padded M divisible by it.
    Prefers >=2 programs (v7x 2 TensorCores / pipelining) when M allows."""
    if M >= 2 * pref:
        tm = pref
    elif M >= 2 * base:
        tm = _round_up((M + 1) // 2, base)
    else:
        tm = _round_up(max(M, 1), base)
    return tm, _round_up(M, tm)


def _pad_rows(x, m_pad):
    m = x.shape[0]
    if m_pad == m:
        return x
    return jnp.pad(x, ((0, m_pad - m), (0, 0)))


# ----------------------------- Pallas kernels ------------------------------

def _linear_kernel(x_ref, w_ref, b_ref, o_ref):
    o_ref[...] = (jnp.dot(x_ref[...].astype(jnp.bfloat16),
                          w_ref[...].astype(jnp.bfloat16),
                          preferred_element_type=jnp.float32)
                  + b_ref[...]).astype(o_ref.dtype)


def linear(x, w, b, out_dtype=jnp.float32):
    """y = x @ w + b, gridded over M (multiple-of-16 tiles, padded)."""
    *lead, K = x.shape
    M = int(np.prod(lead)) if lead else 1
    N = w.shape[1]
    tm, m_pad = _tile_and_pad(M)
    x2 = _pad_rows(x.reshape(M, K), m_pad)
    out = pl.pallas_call(
        _linear_kernel,
        out_shape=jax.ShapeDtypeStruct((m_pad, N), out_dtype),
        grid=(m_pad // tm,),
        in_specs=[
            pl.BlockSpec((tm, K), lambda i: (i, 0)),
            pl.BlockSpec((K, N), lambda i: (0, 0)),
            pl.BlockSpec((1, N), lambda i: (0, 0)),
        ],
        out_specs=pl.BlockSpec((tm, N), lambda i: (i, 0)),
        compiler_params=_compiler_params(),
    )(x2, w, b)
    return out[:M].reshape(*lead, N)


def _geo_kernel(x_ref, w1_ref, b1_ref, w2_ref, b2_ref, o_ref, *, depth):
    """depth x (residual position-wise FFN) on one (tm, F) row tile."""
    w1 = w1_ref[...].astype(jnp.bfloat16)
    w2 = w2_ref[...].astype(jnp.bfloat16)
    b1 = b1_ref[...]
    b2 = b2_ref[...]

    def body(_, x):
        h = jnp.maximum(
            jnp.dot(x.astype(jnp.bfloat16), w1,
                    preferred_element_type=jnp.float32) + b1, 0.0)
        h = jnp.dot(h.astype(jnp.bfloat16), w2,
                    preferred_element_type=jnp.float32) + b2
        return x + h

    o_ref[...] = lax.fori_loop(0, depth, body, x_ref[...].astype(jnp.float32),
                               unroll=True)


def geo_encoder(p, x, depth=4):
    # TODO(synk): GeoEncoder / GeoEncoderLayer are not defined in the reference;
    # synthesized as `depth` residual FFN passes (shared weights).
    B, L, F = x.shape
    M = B * L
    Fh = p["geo_w1"].shape[1]
    tm, m_pad = _tile_and_pad(M)
    x2 = _pad_rows(x.reshape(M, F).astype(jnp.float32), m_pad)
    out = pl.pallas_call(
        functools.partial(_geo_kernel, depth=depth),
        out_shape=jax.ShapeDtypeStruct((m_pad, F), jnp.float32),
        grid=(m_pad // tm,),
        in_specs=[
            pl.BlockSpec((tm, F), lambda i: (i, 0)),
            pl.BlockSpec((F, Fh), lambda i: (0, 0)),
            pl.BlockSpec((1, Fh), lambda i: (0, 0)),
            pl.BlockSpec((Fh, F), lambda i: (0, 0)),
            pl.BlockSpec((1, F), lambda i: (0, 0)),
        ],
        out_specs=pl.BlockSpec((tm, F), lambda i: (i, 0)),
        compiler_params=_compiler_params(),
    )(x2, p["geo_w1"], p["geo_b1"], p["geo_w2"], p["geo_b2"])
    return out[:M].reshape(B, L, F)


def _qkv_kernel(q_ref, k_ref, v_ref, wq_ref, bq_ref, wk_ref, bk_ref,
                wv_ref, bv_ref, qo_ref, ko_ref, vo_ref, *, scale):
    """Q/K/V projections on a (tm, .) row tile of the flattened batch."""
    bf16, f32 = jnp.bfloat16, jnp.float32
    qo_ref[...] = ((jnp.dot(q_ref[...].astype(bf16), wq_ref[...].astype(bf16),
                            preferred_element_type=f32) + bq_ref[...])
                   * scale).astype(bf16)
    ko_ref[...] = (jnp.dot(k_ref[...].astype(bf16), wk_ref[...].astype(bf16),
                           preferred_element_type=f32)
                   + bk_ref[...]).astype(bf16)
    vo_ref[...] = (jnp.dot(v_ref[...].astype(bf16), wv_ref[...].astype(bf16),
                           preferred_element_type=f32)
                   + bv_ref[...]).astype(bf16)


def _qkv_project(pa, q_in, k_in, v_in, scale):
    B, Lq, Dq = q_in.shape
    _, Lk, Dk = k_in.shape
    Dv = v_in.shape[2]
    D = pa["wq"].shape[1]
    M = B * Lq  # Lq == Lk in this model
    tm, m_pad = _tile_and_pad(M)
    q2 = _pad_rows(q_in.reshape(M, Dq), m_pad)
    k2 = _pad_rows(k_in.reshape(M, Dk), m_pad)
    v2 = _pad_rows(v_in.reshape(M, Dv), m_pad)
    q, k, v = pl.pallas_call(
        functools.partial(_qkv_kernel, scale=scale),
        out_shape=(jax.ShapeDtypeStruct((m_pad, D), jnp.bfloat16),
                   jax.ShapeDtypeStruct((m_pad, D), jnp.bfloat16),
                   jax.ShapeDtypeStruct((m_pad, D), jnp.bfloat16)),
        grid=(m_pad // tm,),
        in_specs=[
            pl.BlockSpec((tm, Dq), lambda i: (i, 0)),
            pl.BlockSpec((tm, Dk), lambda i: (i, 0)),
            pl.BlockSpec((tm, Dv), lambda i: (i, 0)),
            pl.BlockSpec((Dq, D), lambda i: (0, 0)),
            pl.BlockSpec((1, D), lambda i: (0, 0)),
            pl.BlockSpec((Dk, D), lambda i: (0, 0)),
            pl.BlockSpec((1, D), lambda i: (0, 0)),
            pl.BlockSpec((Dv, D), lambda i: (0, 0)),
            pl.BlockSpec((1, D), lambda i: (0, 0)),
        ],
        out_specs=[pl.BlockSpec((tm, D), lambda i: (i, 0)),
                   pl.BlockSpec((tm, D), lambda i: (i, 0)),
                   pl.BlockSpec((tm, D), lambda i: (i, 0))],
        compiler_params=_compiler_params(),
    )(q2, k2, v2, pa["wq"], pa["bq"], pa["wk"], pa["bk"], pa["wv"], pa["bv"])
    return (q[:M].reshape(B, Lq, D), k[:M].reshape(B, Lk, D),
            v[:M].reshape(B, Lk, D))


def _make_attn_kernel(has_tmat):
    def kernel(*refs):
        if has_tmat:
            q_ref, k_ref, v_ref, am_ref, pad_ref, tmat_ref, o_ref = refs
        else:
            q_ref, k_ref, v_ref, am_ref, pad_ref, o_ref = refs
            tmat_ref = None
        bf16, f32 = jnp.bfloat16, jnp.float32
        q = q_ref[...]                                   # (H, Lq, hd) bf16
        k = k_ref[...]                                   # (H, Lk, hd) bf16
        v = v_ref[...]                                   # (H, Lk, hd) bf16
        s = jnp.einsum('hqd,hkd->hqk', q, k, preferred_element_type=f32)
        if tmat_ref is not None:
            s = s + tmat_ref[...][None, :, :]
        # mask built in-kernel: shared causal/attn mask * per-batch pad row.
        keep = (am_ref[...] * pad_ref[...]) > 0.0        # (Lq, Lk)
        s = jnp.where(keep[None, :, :], s, _NEG_INF)
        m = jnp.max(s, axis=-1, keepdims=True)
        e = jnp.exp(s - m)
        p_attn = e * pl.reciprocal(jnp.sum(e, axis=-1, keepdims=True),
                                   approx=True)
        # TODO(synk): dropout on attention weights omitted (rate = 0).
        ctx = jnp.einsum('hqk,hkd->hqd', p_attn.astype(bf16), v,
                         preferred_element_type=f32)
        o_ref[...] = ctx.astype(o_ref.dtype)
    return kernel


def _attention_core(q, k, v, attn_mask, pad_mask, tmat, num_heads):
    """Per-batch softmax attention on head-major slabs (no in-kernel slicing)."""
    B, Lq, D = q.shape
    Lk = k.shape[1]
    H = num_heads
    hd = D // H
    q4 = q.reshape(B, Lq, H, hd).transpose(0, 2, 1, 3)
    k4 = k.reshape(B, Lk, H, hd).transpose(0, 2, 1, 3)
    v4 = v.reshape(B, Lk, H, hd).transpose(0, 2, 1, 3)
    pad3 = pad_mask.astype(jnp.float32).reshape(B, 1, Lk)
    am = attn_mask.astype(jnp.float32)
    has_tmat = tmat is not None
    in_specs = [
        pl.BlockSpec((None, H, Lq, hd), lambda b: (b, 0, 0, 0)),
        pl.BlockSpec((None, H, Lk, hd), lambda b: (b, 0, 0, 0)),
        pl.BlockSpec((None, H, Lk, hd), lambda b: (b, 0, 0, 0)),
        pl.BlockSpec((Lq, Lk), lambda b: (0, 0)),
        pl.BlockSpec((None, 1, Lk), lambda b: (b, 0, 0)),
    ]
    args = [q4, k4, v4, am, pad3]
    if has_tmat:
        in_specs.append(pl.BlockSpec((None, Lq, Lk), lambda b: (b, 0, 0)))
        args.append(tmat.astype(jnp.float32))
    ctx4 = pl.pallas_call(
        _make_attn_kernel(has_tmat),
        out_shape=jax.ShapeDtypeStruct((B, H, Lq, hd), jnp.bfloat16),
        grid=(B,),
        in_specs=in_specs,
        out_specs=pl.BlockSpec((None, H, Lq, hd), lambda b: (b, 0, 0, 0)),
        compiler_params=_compiler_params(),
    )(*args)
    return ctx4.transpose(0, 2, 1, 3).reshape(B, Lq, D)


def _outproj_residual_kernel(ctx_ref, res_ref, wo_ref, bo_ref, o_ref):
    out = jnp.dot(ctx_ref[...].astype(jnp.bfloat16),
                  wo_ref[...].astype(jnp.bfloat16),
                  preferred_element_type=jnp.float32) + bo_ref[...]
    o_ref[...] = out + res_ref[...]


def _outproj_ffn_kernel(ctx_ref, res_ref, wo_ref, bo_ref,
                        w1_ref, b1_ref, w2_ref, b2_ref, o_ref):
    """x = ctx@Wo + bo + residual; out = x + FFN(x); hidden never leaves VMEM."""
    bf16, f32 = jnp.bfloat16, jnp.float32
    x = (jnp.dot(ctx_ref[...].astype(bf16), wo_ref[...].astype(bf16),
                 preferred_element_type=f32) + bo_ref[...] + res_ref[...])
    h = jnp.maximum(
        jnp.dot(x.astype(bf16), w1_ref[...].astype(bf16),
                preferred_element_type=f32) + b1_ref[...], 0.0)
    o_ref[...] = x + jnp.dot(h.astype(bf16), w2_ref[...].astype(bf16),
                             preferred_element_type=f32) + b2_ref[...]


# ------------------------------ model pieces -------------------------------

def _attn_params(p, prefix):
    return {k: p[f"{prefix}_{k}"] for k in
            ("wq", "bq", "wk", "bk", "wv", "bv", "wo", "bo")}


def tscab(p, trg_timefeature, src_timefeature, src, attn_mask, pad_mask):
    # TODO(synk): TSCAB internals undefined; synthesized as temporal cross
    # attention (q=target time feat, k=source time feat, v=src) + residual.
    pa = _attn_params(p, "tscab")
    D = pa["wq"].shape[1]
    q, k, v = _qkv_project(pa, trg_timefeature, src_timefeature, src,
                           float(D // 8) ** -0.5)
    ctx = _attention_core(q, k, v, attn_mask, pad_mask, tmat=None, num_heads=8)
    B, L, _ = src.shape
    M = B * L
    tm, m_pad = _tile_and_pad(M)
    out = pl.pallas_call(
        _outproj_residual_kernel,
        out_shape=jax.ShapeDtypeStruct((m_pad, D), jnp.float32),
        grid=(m_pad // tm,),
        in_specs=[
            pl.BlockSpec((tm, D), lambda i: (i, 0)),
            pl.BlockSpec((tm, D), lambda i: (i, 0)),
            pl.BlockSpec((D, D), lambda i: (0, 0)),
            pl.BlockSpec((1, D), lambda i: (0, 0)),
        ],
        out_specs=pl.BlockSpec((tm, D), lambda i: (i, 0)),
        compiler_params=_compiler_params(),
    )(_pad_rows(ctx.reshape(M, D), m_pad),
      _pad_rows(src.reshape(M, D).astype(jnp.float32), m_pad),
      pa["wo"], pa["bo"])
    return out[:M].reshape(B, L, D)


def tiab(p, q_in, k_in, v_in, tmat, attn_mask, pad_mask):
    # TODO(synk): TIAB internals undefined; synthesized as time-interval-aware
    # attention (interval matrix added to QK^T scores) + residual FFN.
    pa = _attn_params(p, "tiab")
    D = pa["wq"].shape[1]
    Fh = p["tiab_ffn_w1"].shape[1]
    q, k, v = _qkv_project(pa, q_in, k_in, v_in, float(D // 8) ** -0.5)
    ctx = _attention_core(q, k, v, attn_mask, pad_mask, tmat=tmat, num_heads=8)
    B, L, _ = q_in.shape
    M = B * L
    tm, m_pad = _tile_and_pad(M)
    out = pl.pallas_call(
        _outproj_ffn_kernel,
        out_shape=jax.ShapeDtypeStruct((m_pad, D), jnp.float32),
        grid=(m_pad // tm,),
        in_specs=[
            pl.BlockSpec((tm, D), lambda i: (i, 0)),
            pl.BlockSpec((tm, D), lambda i: (i, 0)),
            pl.BlockSpec((D, D), lambda i: (0, 0)),
            pl.BlockSpec((1, D), lambda i: (0, 0)),
            pl.BlockSpec((D, Fh), lambda i: (0, 0)),
            pl.BlockSpec((1, Fh), lambda i: (0, 0)),
            pl.BlockSpec((Fh, D), lambda i: (0, 0)),
            pl.BlockSpec((1, D), lambda i: (0, 0)),
        ],
        out_specs=pl.BlockSpec((tm, D), lambda i: (i, 0)),
        compiler_params=_compiler_params(),
    )(_pad_rows(ctx.reshape(M, D), m_pad),
      _pad_rows(q_in.reshape(M, D).astype(jnp.float32), m_pad),
      pa["wo"], pa["bo"],
      p["tiab_ffn_w1"], p["tiab_ffn_b1"], p["tiab_ffn_w2"], p["tiab_ffn_b2"])
    return out[:M].reshape(B, L, D)


def get_tmat_train(src_time, trg_time, k_t, max_len):
    B = src_time.shape[0]
    ti = jnp.broadcast_to(trg_time[:, :, None], (B, max_len, max_len))
    tj = jnp.broadcast_to(src_time[:, None, :], (B, max_len, max_len))
    tm = jnp.abs(ti - tj) / (3600.0 * 24)
    tmax = jnp.ones_like(tm) * k_t
    return jnp.where(tm > tmax, tmax, tm) - tm


def calc_distance_score(src_lat, src_lng, src_size, trg_size, k_d):
    # Kept exactly as the reference (trg coords == last coords -> constant score).
    last_idx = src_size - 1
    b = src_lat.shape[0]
    last_lat = src_lat[jnp.arange(b), last_idx] * jnp.pi / 180.0
    last_lng = src_lng[jnp.arange(b), last_idx] * jnp.pi / 180.0
    last_lat = jnp.repeat(last_lat[:, None], trg_size, axis=1)
    last_lng = jnp.repeat(last_lng[:, None], trg_size, axis=1)
    trg_lat, trg_lng = last_lat, last_lng
    dlat = trg_lat - last_lat
    dlng = trg_lng - last_lng
    a = jnp.sin(dlat / 2) ** 2 + jnp.cos(last_lat) * jnp.cos(trg_lat) * jnp.sin(dlng / 2) ** 2
    c = 2.0 * jnp.arcsin(jnp.sqrt(jnp.clip(a, 0.0, 1.0)))
    distances = c * 6371.0
    return jnp.exp(-distances / k_d)


def stisan_forward(params, inputs, *, src_len, k_t, k_d, training=True):
    src_timecodes = inputs["src_timecodes"].astype(jnp.float32)
    trg_time_grams = inputs["trg_time_grams"].astype(jnp.float32)

    # TODO(synk): Embedding(n, f, True, True) flags assumed to mean padding_idx=0.
    src_loc_emb = jnp.take(params["emb_loc"], inputs["src_loc"], axis=0)
    src_quadkey_emb = jnp.take(params["emb_quadkey"], inputs["src_quadkey"], axis=0)
    trg_loc_emb = jnp.take(params["emb_loc"], inputs["trg_loc"], axis=0)
    trg_quadkey_emb = jnp.take(params["emb_quadkey"], inputs["trg_quadkey"], axis=0)

    B = src_timecodes.shape[0]
    # TODO(synk): TimeFeatureEmbedding(5, features) synthesized as Linear(5, features).
    # Fused src+trg time-feature projection; bf16 out (MXU-only consumer downstream).
    tf_all = linear(jnp.concatenate([src_timecodes, trg_time_grams], axis=0),
                    params["tf_w"], params["tf_b"], out_dtype=jnp.bfloat16)
    src_timefeature, trg_timefeature = tf_all[:B], tf_all[B:]

    # Fused src+trg quadkey geo encoding in ONE pallas_call (shared weights).
    geo_all = geo_encoder(params,
                          jnp.concatenate([src_quadkey_emb, trg_quadkey_emb], axis=0),
                          depth=4)
    src_quadkey_emb, trg_quadkey_emb = geo_all[:B], geo_all[B:]

    src = jnp.concatenate([src_loc_emb, src_quadkey_emb], axis=-1)
    trg = jnp.concatenate([trg_loc_emb, trg_quadkey_emb], axis=-1)

    if training:
        trg_tmat = get_tmat_train(inputs["src_time"], inputs["trg_time"], k_t, src_len)
    else:
        raise NotImplementedError  # TODO(synk): eval path (get_tmat_eval) not exercised.

    attn_mask = inputs["attn_mask"].astype(jnp.float32)
    pad_mask = inputs["pad_mask"].astype(jnp.float32)

    src_person = tscab(params, trg_timefeature, src_timefeature, src,
                       attn_mask, pad_mask)
    src_out = tiab(params, src_person, src, src, trg_tmat, attn_mask, pad_mask)

    dist_score = calc_distance_score(inputs["src_lat"], inputs["src_lon"],
                                     jnp.asarray(inputs["ds"]), trg.shape[1], k_d)
    # Final (B, Tt) sim + dist: tiny elementwise reduce -- plain XLA per review
    # (a pallas_call launch would cost more than the math at this size).
    reps = trg.shape[1] // src_out.shape[1]
    src_rep = jnp.tile(src_out, (1, reps, 1)) if reps > 1 else src_out
    sim_score = jnp.sum(src_rep * trg, axis=-1)
    return sim_score + dist_score


# ------------------------------- init helpers ------------------------------

def init_params(key, n_loc, n_quadkey, features, exp_factor):
    f2 = features * 2
    ks = jax.random.split(key, 16)

    def lin(k, din, dout):
        return (jax.random.normal(k, (din, dout), jnp.float32) * 0.05,
                jnp.zeros((1, dout), jnp.float32))

    p = {}
    emb_loc = jax.random.normal(ks[0], (n_loc, features), jnp.float32) * 0.05
    p["emb_loc"] = emb_loc.at[0].set(0.0)
    emb_qk = jax.random.normal(ks[1], (n_quadkey, features), jnp.float32) * 0.05
    p["emb_quadkey"] = emb_qk.at[0].set(0.0)
    p["tf_w"], p["tf_b"] = lin(ks[2], 5, features)
    p["geo_w1"], p["geo_b1"] = lin(ks[3], features, features * exp_factor)
    p["geo_w2"], p["geo_b2"] = lin(ks[4], features * exp_factor, features)
    p["tscab_wq"], p["tscab_bq"] = lin(ks[5], features, f2)
    p["tscab_wk"], p["tscab_bk"] = lin(ks[6], features, f2)
    p["tscab_wv"], p["tscab_bv"] = lin(ks[7], f2, f2)
    p["tscab_wo"], p["tscab_bo"] = lin(ks[8], f2, f2)
    p["tiab_wq"], p["tiab_bq"] = lin(ks[9], f2, f2)
    p["tiab_wk"], p["tiab_bk"] = lin(ks[10], f2, f2)
    p["tiab_wv"], p["tiab_bv"] = lin(ks[11], f2, f2)
    p["tiab_wo"], p["tiab_bo"] = lin(ks[12], f2, f2)
    p["tiab_ffn_w1"], p["tiab_ffn_b1"] = lin(ks[13], f2, f2 * exp_factor)
    p["tiab_ffn_w2"], p["tiab_ffn_b2"] = lin(ks[14], f2 * exp_factor, f2)
    # TODO(synk): self.multi_head_attn is created in __init__ but never used in forward.
    return p


# ----------------------------------- main -----------------------------------

if __name__ == "__main__":
    B, L, F = 2, 8, 32
    N_LOC, N_QK = 50, 60
    EXP_FACTOR = 2
    K_T, K_D = 10.0, 15.0

    key = jax.random.PRNGKey(0)
    kp, *ks = jax.random.split(key, 12)
    params = init_params(kp, N_LOC, N_QK, F, EXP_FACTOR)

    src_loc = jax.random.randint(ks[0], (B, L), 1, N_LOC)
    src_quadkey = jax.random.randint(ks[1], (B, L), 1, N_QK)
    trg_loc = jax.random.randint(ks[2], (B, L), 1, N_LOC)
    trg_quadkey = jax.random.randint(ks[3], (B, L), 1, N_QK)
    src_time = jnp.sort(jax.random.uniform(ks[4], (B, L), jnp.float32,
                                           0.0, 30 * 86400.0), axis=1)
    trg_time = src_time + 3600.0
    src_timecodes = jax.random.uniform(ks[5], (B, L, 5), jnp.float32)
    trg_time_grams = jax.random.uniform(ks[6], (B, L, 5), jnp.float32)
    src_lat = jax.random.uniform(ks[7], (B, L), jnp.float32, -30.0, 30.0)
    src_lon = jax.random.uniform(ks[8], (B, L), jnp.float32, -120.0, 120.0)
    pad_mask = jnp.ones((B, L), jnp.float32)
    attn_mask = jnp.tril(jnp.ones((L, L), jnp.float32))
    ds = jnp.array([L, L], jnp.int32)   # valid sequence lengths per batch element

    inputs = dict(
        src_loc=src_loc, src_quadkey=src_quadkey, src_time=src_time,
        src_timecodes=src_timecodes, src_lat=src_lat, src_lon=src_lon,
        pad_mask=pad_mask, attn_mask=attn_mask,
        trg_loc=trg_loc, trg_quadkey=trg_quadkey, trg_time=trg_time,
        trg_time_grams=trg_time_grams, ds=ds,
    )

    out = stisan_forward(params, inputs, src_len=L, k_t=K_T, k_d=K_D, training=True)
    out = jax.block_until_ready(out)
    assert out.shape == (B, L) and out.dtype == jnp.float32
    print("KERNEL_OK")
</pallas_src>

<mosaic_0001>
module attributes {stable_mosaic.version = 11 : i64} {
  func.func @_linear_kernel(%arg0: i32, %arg1: memref<16x5xf32, #tpu.memory_space<vmem>>, %arg2: memref<5x32xf32, #tpu.memory_space<vmem>>, %arg3: memref<1x32xf32, #tpu.memory_space<vmem>>, %arg4: memref<16x32xbf16, #tpu.memory_space<vmem>>) attributes {dimension_semantics = [#tpu.dimension_semantics<parallel>], iteration_bounds = array<i64: 2>, scalar_prefetch = 0 : i64, scratch_operands = 0 : i64, tpu.core_type = #tpu.core_type<tc>, window_params = [{transform_indices = @transform_0, window_bounds = array<i64: 16, 5>}, {pipeline_mode = #tpu.pipeline_mode<synchronous>, transform_indices = @transform_1, window_bounds = array<i64: 5, 32>}, {pipeline_mode = #tpu.pipeline_mode<synchronous>, transform_indices = @transform_2, window_bounds = array<i64: 1, 32>}, {transform_indices = @transform_3, window_bounds = array<i64: 16, 32>}]} {
    %c0 = arith.constant 0 : index
    %c0_0 = arith.constant 0 : index
    %0 = vector.load %arg1[%c0, %c0_0] : memref<16x5xf32, #tpu.memory_space<vmem>>, vector<16x5xf32>
    %1 = arith.truncf %0 : vector<16x5xf32> to vector<16x5xbf16>
    %c0_1 = arith.constant 0 : index
    %c0_2 = arith.constant 0 : index
    %2 = vector.load %arg2[%c0_1, %c0_2] : memref<5x32xf32, #tpu.memory_space<vmem>>, vector<5x32xf32>
    %3 = arith.truncf %2 : vector<5x32xf32> to vector<5x32xbf16>
    %cst = arith.constant dense<0.000000e+00> : vector<16x32xf32>
    %4 = tpu.matmul %1, %3, %cst {dimension_numbers = #tpu.dot_dimension_numbers<[1], [0], [0], [1], [0, 0, 1, 1], [], []>} : vector<16x5xbf16>, vector<5x32xbf16>, vector<16x32xf32> -> vector<16x32xf32>
    %c0_3 = arith.constant 0 : index
    %c0_4 = arith.constant 0 : index
    %5 = vector.load %arg3[%c0_3, %c0_4] : memref<1x32xf32, #tpu.memory_space<vmem>>, vector<1x32xf32>
    %6 = vector.broadcast %5 : vector<1x32xf32> to vector<16x32xf32>
    %7 = arith.addf %4, %6 : vector<16x32xf32>
    %8 = arith.truncf %7 : vector<16x32xf32> to vector<16x32xbf16>
    %c0_5 = arith.constant 0 : index
    %c0_6 = arith.constant 0 : index
    %9 = vector.load %arg4[%c0_5, %c0_6] : memref<16x32xbf16, #tpu.memory_space<vmem>>, vector<16x32xbf16>
    tpu.vector_store %arg4[%c0_5, %c0_6], %8 {strides = array<i32>} : memref<16x32xbf16, #tpu.memory_space<vmem>>, vector<16x32xbf16>,
    return
  }
  func.func @transform_0(%arg0: i32) -> (i32, i32) {
    %c0_i32 = arith.constant 0 : i32
    %c0_i32_0 = arith.constant 0 : i32
    return %arg0, %c0_i32 : i32, i32
  }
  func.func @transform_1(%arg0: i32) -> (i32, i32) {
    %c0_i32 = arith.constant 0 : i32
    %c0_i32_0 = arith.constant 0 : i32
    %c0_i32_1 = arith.constant 0 : i32
    return %c0_i32, %c0_i32_0 : i32, i32
  }
  func.func @transform_2(%arg0: i32) -> (i32, i32) {
    %c0_i32 = arith.constant 0 : i32
    %c0_i32_0 = arith.constant 0 : i32
    %c0_i32_1 = arith.constant 0 : i32
    return %c0_i32, %c0_i32_0 : i32, i32
  }
  func.func @transform_3(%arg0: i32) -> (i32, i32) {
    %c0_i32 = arith.constant 0 : i32
    %c0_i32_0 = arith.constant 0 : i32
    return %arg0, %c0_i32 : i32, i32
  }
}

</mosaic_0001>

<bundles_post_ra>
// kernel: tpu_custom_call.1
= control target key start
LH: loop header
LB: loop body
LE: loop exit
PB: predicated region body
PF: predicated region fallthrough
CT: control target
= control target key end

     0   :  { %8 = vsyncpa [#allocation3], 0  ;;  %s524_s0 = inlined_call_operand.vmem [shape: f32[32,5], index: 0, kind: input, shape index: {}]   ;;  %s525_s1 = inlined_call_operand.vmem [shape: f32[5,32], index: 1, kind: input, shape index: {}]   ;;  %s526_s2 = inlined_call_operand.vmem [shape: f32[1,32], index: 2, kind: input, shape index: {}]   ;;  %s527_s3 = inlined_call_operand.hbm [shape: bf16[32,32], index: 3, kind: output, shape index: {}]  }
   0x1   :  { %10 = vsyncpa [#allocation3 + $0x1], 0  ;;  %s434_s12 = smov 0   ;;  %s436_s13 = smov 0  }
   0x2   :  { %s438_s14 = smov 0   ;;  %s440_s15 = smov 0  }
   0x3 LB: > { %s455_s16 = sadd.s32 4294967295, %s409_s15   ;;  %s290_s17 = sadd.s32 4294967294, %s409_s15   ;;  %s409_s15 = sphi %s440_s15, %s533_s15   ;;  %s405_s14 = sphi %s438_s14, %s532_s14   ;;  %s401_s13 = sphi %s436_s13, %s531_s13   ;;  %s397_s12 = sphi %s434_s12, %s530_s12  }
   0x4   : > { %s459_s18 = sadd.s32 1, %s409_s15   ;;  %s91_s19 = sadd.s32 1, %s405_s14 }
   0x5   : > { %s88_s20 = ssub.s32 %s409_s15, %s459_s18  ;;  %p101_p0 = scmp.ne.s32.totalorder %s405_s14, %s401_s13 }
   0x6   : > { %p89_p1 = scmp.eq.s32.totalorder %s88_s20, 0  ;;  %p102_p2 = scmp.eq.s32.totalorder %s455_s16, 1 }
   0x7   : > { %p107_p3 = scmp.ne.s32.totalorder %s401_s13, %s397_s12  ;;  %p108_p4 = scmp.eq.s32.totalorder %s290_s17, 1 }
   0x8   : > { %s470_s21 = scalar_select %p89_p1, %s405_s14, %s91_s19  }
   0x9   : > { %p472_p5 = por %p102_p2, %p101_p0  ;;  %p476_p6 = por %p108_p4, %p107_p3 }
   0xa   : > { %p293_p7 = scmp.ge.s32.totalorder %s409_s15, 1  ;;  %p141_p8 = scmp.lt.s32.totalorder %s409_s15, 3 }
   0xc   : > { %p142_p9 = pnand %p293_p7, %p141_p8 }
   0xd   : > { %s295_s26 = sshll.u32 (!%p142_p9), %s455_s16, 1  ;;  %s162_s4 = sand.u32 (!%p142_p9), 1, %s401_s13  }
   0xe   : > { %145 = sbr.rel (%p142_p9) target bundleno = 169 (0xa9), region = 32  ;;  %p166_p10 = scmp.lt.s32.totalorder (!%p142_p9), %s295_s26, 3 }
   0xf   : > { %s294_s7 = sshll.u32 (!%p142_p9), %s162_s4, 3  ;;  %s303_s8 = sshll.u32 (!%p142_p9), %s455_s16, 3 }
  0x10   : > { %s224_s11 = scalar_lea.hbm (!%p142_p9), %s527_s3, %s303_s8  ;;  %s164_s17 = scalar_lea.vmem (!%p142_p9), [#allocation2], %s294_s7 }
  0x11   : > { %s225_s19 = sshll.u32 (!%p142_p9), %s164_s17, 4  ;;  %s227_s20 = sshll.u32 (!%p142_p9), %s224_s11, 4  ;;  %s226_s19 = int_to_ptr.vmem [resolvable:$true] %s225_s19  ;;  %s228_s20 = int_to_ptr.hbm [resolvable:$true] %s227_s20 }
  0x12   : > { %s213_s24 = scalar_lea.sflag (!%p142_p9), [#allocation3], %s162_s4  ;;  %s361_s25 = sshra.s32 (!%p142_p9), %s228_s20, 4  ;;  %s362_s25 = int_to_ptr.hbm [resolvable:$true] %s361_s25 }
  0x13   : > { %v176_v0 = vld [vmem:[%s525_s1] sm:$0x1f]  ;;  %vm186_vm0 = vcmask 1041408   ;;  %vm187_vm1 = vcmask 1042432   ;;  %v411_v2 = vmov 65535   ;;  %s535_s26 = smov (!%p166_p10, %s295_s26), 3  ;;  %p368_p0 = scmp.lt.s32.totalorder %s362_s25, %s527_s3 }
  0x14   : > { %v177_v1 = vpack.c.bf16 %v176_v0, %v176_v0  ;;  %v188_v3 = vsel %vm186_vm0, 4294967295, %v411_v2  ;;  %s296_s27 = sshll.u32 %s535_s26, 3  ;;  %vm182_vm2 = vcmask 39936   ;;  %v346_v9 = vld [vmem:[%s526_s2] ss:$0 sm:$0xff]  ;;  %vm209_vm3 = vcmask 257024  }
  0x15   : > { %v189_v4 = vsel %vm187_vm1, %v188_v3, 0  ;;  %s169_s30 = scalar_lea.vmem %s524_s0, %s296_s27  ;;  %s363_s16 = scalar_lea.hbm %s362_s25, 8 }
  0x16   : > { %v191_v5 = vand.u32 %v189_v4, %v177_v1  ;;  %v173_v6 = vld [vmem:[%s169_s30] sm:$0xff]  ;;  %v174_v7 = vld [vmem:[%s169_s30 + $0x8] sm:$0xff]  ;;  %p364_p11 = scmp.ne.s32.totalorder %s362_s25, %s363_s16  ;;  %s367_s28 = scalar_lea.hbm %s527_s3, 16 }
  0x17   : > { %v175_v8 = vpack.c.bf16 %v174_v7, %v173_v6  ;;  %p369_p1 = scmp.lt.s32.totalorder %s367_s28, %s363_s16 }
  0x18   : > { %200 = vmatpush.bf16.msra.mxu0 %v191_v5  ;;  %p365_p12 = pnand %p364_p11, %p472_p5 }
  0x19   : > { %p370_p2 = por %p369_p1, %p368_p0 }
  0x1a   : > { %p366_p13 = pneg %p365_p12 }
  0x1b   : > { %297 = vmatmul.msk.bf16.vlgmr.msra.gmra.mxu0 %vm182_vm2, %v175_v8 }
  0x1c   : > { %p371_p3 = pnand %p370_p2, %p366_p13 }
  0x98   : > { %v202_v10 = vpop.f32.mrf.mxu0 }
  0x99   : > { %v203_v11 = vadd.f32 %v346_v9, %v202_v10 }
  0x9b   : > { %v207_v12 = vpack.c.bf16 %v203_v11, %v203_v11 }
  0x9d   : > { %210 = vst.msk [vmem:[%s164_s17] sm:$0xf] %vm209_vm3, %v207_v12 }
  0xa0   : > { %v204_v13 = vpop.f32.mrf.mxu0 }
  0xa1   : > { %v205_v14 = vadd.f32 %v346_v9, %v204_v13 }
  0xa3   : > { %v208_v15 = vpack.c.bf16 %v205_v14, %v205_v14 }
  0xa5   : > { %211 = vst.msk [vmem:[%s164_s17 + $0x4] sm:$0xf] %vm209_vm3, %v208_v15 }
  0xa6   : > { %374 = shalt.err (!%p371_p3)
}
  0xa7   : > { %s412_s4 = smov 64   ;;  %s413_s5 = smov 4  }
  0xa8   : > { %304 = dma.vmem_to_hbm [thread:$0]  (%p472_p5), %s226_s19, 128, %s228_s20, %s213_s24, %s412_s4, %s412_s4, %s413_s5  }
  0xa9 PF: > { %p310_p4 = scmp.ge.s32.totalorder %s409_s15, 2  ;;  %s242_s6 = sand.u32 1, %s397_s12  }
  0xaa   : > { %s243_s7 = scalar_lea.sflag [#allocation3], %s242_s6 }
  0xab   : > { %p307_p7 = pnand %p310_p4, %p476_p6 }
  0xad   : > { %p308_p8 = pneg %p307_p7 }
  0xaf   : > { %392 = dma.done.wait (%p308_p8), %s243_s7, 128  }
  0xb0   : > { %394 = vsyncadd (%p308_p8), %s243_s7, 4294967168  ;;  %p13_p9 = scmp.ge.s32.totalorder %s459_s18, 4   ;;  %s530_s12 = smov %s401_s13 }
  0xb1   : > { %s531_s13 = smov %s405_s14  ;;  %s532_s14 = smov %s470_s21 }
  0xb2   : > { %s533_s15 = smov %s459_s18  ;;  %15 = sbr.rel (!%p13_p9) target bundleno = 3 (0x3), region = 67 }
  0xb7   :  { %249 = vsyncpa [#allocation3], 1 }
  0xb8   :  { %251 = vsyncpa [#allocation3 + $0x1], 1 }

</bundles_post_ra>
